<compile_context>
chip_gen: v7x
topology: tpu7x:2x2x1
jax: 0.10.0
libtpu: 0.0.40
codegen_flags: <defaults>
</compile_context>

<pallas_src>
import functools

import jax
import jax.numpy as jnp
from jax import lax
from jax.experimental import pallas as pl
from jax.experimental.pallas import tpu as pltpu

ALPHA = 0.25
GAMMA = 2


def _round_up(a, b):
    return ((a + b - 1) // b) * b


def _focal_bce_kernel(x_ref, t_ref, out_ref, acc_ref, *, gamma, numel,
                      block_rows, lane, num_inner, first_pad_step, pad_total):
    """Accumulates sum((1 - sigmoid(x))**gamma * bce(x, t)) per outer slice."""
    c = pl.program_id(0)          # "parallel" axis (TensorCore split on v7x)
    i = pl.program_id(1)          # "arbitrary" reduction axis

    @pl.when(i == 0)
    def _():
        acc_ref[...] = jnp.zeros_like(acc_ref)

    x = x_ref[...].astype(jnp.float32)
    t = t_ref[...].astype(jnp.float32)

    # Single exp per element; both bce and (1-p) are derived from it.
    e = jnp.exp(-jnp.abs(x))
    bce = jnp.maximum(x, 0.0) - x * t + jnp.log1p(e)
    # sigmoid(x) from e:  1 - p = where(x >= 0, e, 1) / (1 + e)
    one_minus_p = jnp.where(x >= 0.0, e, 1.0) / (1.0 + e)
    if gamma == 2:
        w = one_minus_p * one_minus_p
    else:
        w = one_minus_p ** gamma            # gamma is a static Python int
    focal = w * bce                         # alpha applied in the wrapper

    gstep = c * num_inner + i               # global row-block index

    if pad_total > 0:
        # Only tiles at/after first_pad_step can contain padded elements.
        @pl.when(gstep >= first_pad_step)
        def _():
            rid = lax.broadcasted_iota(jnp.int32, focal.shape, 0)
            cid = lax.broadcasted_iota(jnp.int32, focal.shape, 1)
            gflat = (gstep * block_rows + rid) * lane + cid
            acc_ref[...] += jnp.where(gflat < numel, focal, 0.0)

        @pl.when(gstep < first_pad_step)
        def _():
            acc_ref[...] += focal
    else:
        acc_ref[...] += focal

    # One cross-vreg reduce + output write per core, at the last step only.
    @pl.when(i == pl.num_programs(1) - 1)
    def _():
        partial = acc_ref[...].reshape(block_rows // 8, 8, lane).sum(axis=0)
        out_ref[...] = partial[None]


def focal_bce_with_logits_loss(inputs, targets, *, alpha=ALPHA, gamma=GAMMA,
                               lane=512, target_tile_bytes=2 * 1024 * 1024):
    """Pallas implementation of FocalBCEWithLogitsLoss().forward(inputs, targets)."""
    assert inputs.shape == targets.shape
    numel = int(inputs.size)

    # Lane-dense flatten: (numel) -> padded (rows, lane) with lane % 128 == 0.
    x = inputs.reshape(-1)
    t = targets.reshape(-1)

    rows_needed = -(-numel // lane)
    # ~2 MiB f32 tile; multiple of 16 rows (safe for f32 and bf16 tiling).
    block_rows = min(max(target_tile_bytes // (lane * 4), 16),
                     _round_up(rows_needed, 16))
    block_rows = _round_up(block_rows, 16)

    blocks_needed = -(-rows_needed // block_rows)
    num_outer = 2 if blocks_needed >= 2 else 1     # 2-TC split on v7x
    num_inner = -(-blocks_needed // num_outer)
    rows_padded = num_outer * num_inner * block_rows

    pad_total = rows_padded * lane - numel
    if pad_total:
        x = jnp.pad(x, (0, pad_total))
        t = jnp.pad(t, (0, pad_total))
    x = x.reshape(rows_padded, lane)
    t = t.reshape(rows_padded, lane)

    tile_elems = block_rows * lane
    first_pad_step = numel // tile_elems

    kernel = functools.partial(
        _focal_bce_kernel, gamma=int(gamma), numel=numel,
        block_rows=block_rows, lane=lane, num_inner=num_inner,
        first_pad_step=first_pad_step, pad_total=pad_total)

    partials = pl.pallas_call(
        kernel,
        out_shape=jax.ShapeDtypeStruct((num_outer, 8, lane), jnp.float32),
        grid_spec=pltpu.PrefetchScalarGridSpec(
            num_scalar_prefetch=0,
            grid=(num_outer, num_inner),
            in_specs=[
                pl.BlockSpec((block_rows, lane),
                             lambda c, i: (c * num_inner + i, 0)),
                pl.BlockSpec((block_rows, lane),
                             lambda c, i: (c * num_inner + i, 0)),
            ],
            out_specs=pl.BlockSpec((1, 8, lane), lambda c, i: (c, 0, 0)),
            scratch_shapes=[pltpu.VMEM((block_rows, lane), jnp.float32)],
        ),
        compiler_params=pltpu.CompilerParams(
            dimension_semantics=("parallel", "arbitrary"),
            vmem_limit_bytes=32 * 1024 * 1024,
        ),
    )(x, t)

    # alpha and mean (sum / numel) hoisted out of the vector inner loop.
    return jnp.float32(alpha) * jnp.sum(partials) / jnp.float32(numel)


def _reference(inputs, targets, alpha=ALPHA, gamma=GAMMA):
    x = inputs.astype(jnp.float32)
    t = targets.astype(jnp.float32)
    bce = jnp.maximum(x, 0.0) - x * t + jnp.log1p(jnp.exp(-jnp.abs(x)))
    p = jax.nn.sigmoid(x)
    return jnp.mean(alpha * (1.0 - p) ** gamma * bce)


if __name__ == "__main__":
    key = jax.random.PRNGKey(0)
    k1, k2 = jax.random.split(key)
    # Small shapes consistent with a classification head: batch=16, classes=128.
    B, D = 16, 128
    logits = jax.random.normal(k1, (B, D), dtype=jnp.float32) * 2.0
    targets = (jax.random.uniform(k2, (B, D)) > 0.5).astype(jnp.float32)

    loss = focal_bce_with_logits_loss(logits, targets)
    loss = jax.block_until_ready(loss)

    ref = jax.block_until_ready(_reference(logits, targets))
    assert jnp.allclose(loss, ref, rtol=1e-5, atol=1e-6), (loss, ref)

    print("KERNEL_OK")
</pallas_src>

<mosaic_0001>
module attributes {stable_mosaic.version = 11 : i64} {
  func.func @_focal_bce_kernel(%arg0: i32, %arg1: i32, %arg2: memref<16x512xf32, #tpu.memory_space<vmem>>, %arg3: memref<16x512xf32, #tpu.memory_space<vmem>>, %arg4: memref<1x8x512xf32, #tpu.memory_space<vmem>>, %arg5: memref<16x512xf32, #tpu.memory_space<vmem>>) attributes {dimension_semantics = [#tpu.dimension_semantics<parallel>, #tpu.dimension_semantics<arbitrary>], iteration_bounds = array<i64: 1, 1>, scalar_prefetch = 0 : i64, scratch_operands = 1 : i64, tpu.core_type = #tpu.core_type<tc>, window_params = [{transform_indices = @transform_0, window_bounds = array<i64: 16, 512>}, {transform_indices = @transform_1, window_bounds = array<i64: 16, 512>}, {transform_indices = @transform_2, window_bounds = array<i64: 1, 8, 512>}]} {
    %c0_i32 = arith.constant 0 : i32
    %0 = arith.cmpi eq, %arg1, %c0_i32 : i32
    %1 = arith.extui %0 : i1 to i32
    %c0_i32_0 = arith.constant 0 : i32
    %2 = arith.cmpi ne, %1, %c0_i32_0 : i32
    scf.if %2 {
      %cst_14 = arith.constant 0.000000e+00 : f32
      %35 = vector.broadcast %cst_14 : f32 to vector<16x512xf32>
      %c0_15 = arith.constant 0 : index
      %c0_16 = arith.constant 0 : index
      %36 = vector.load %arg5[%c0_15, %c0_16] : memref<16x512xf32, #tpu.memory_space<vmem>>, vector<16x512xf32>
      tpu.vector_store %arg5[%c0_15, %c0_16], %35 {strides = array<i32>} : memref<16x512xf32, #tpu.memory_space<vmem>>, vector<16x512xf32>,
    } else {
    }
    %c0 = arith.constant 0 : index
    %c0_1 = arith.constant 0 : index
    %3 = vector.load %arg2[%c0, %c0_1] : memref<16x512xf32, #tpu.memory_space<vmem>>, vector<16x512xf32>
    %c0_2 = arith.constant 0 : index
    %c0_3 = arith.constant 0 : index
    %4 = vector.load %arg3[%c0_2, %c0_3] : memref<16x512xf32, #tpu.memory_space<vmem>>, vector<16x512xf32>
    %5 = math.absf %3 : vector<16x512xf32>
    %cst = arith.constant 0.000000e+00 : f32
    %6 = vector.broadcast %cst : f32 to vector<16x512xf32>
    %7 = arith.subf %6, %5 : vector<16x512xf32>
    %8 = math.exp %7 : vector<16x512xf32>
    %cst_4 = arith.constant 0.000000e+00 : f32
    %9 = vector.broadcast %cst_4 : f32 to vector<16x512xf32>
    %10 = arith.maximumf %3, %9 : vector<16x512xf32>
    %11 = arith.mulf %3, %4 : vector<16x512xf32>
    %12 = arith.subf %10, %11 : vector<16x512xf32>
    %13 = math.log1p %8 : vector<16x512xf32>
    %14 = arith.addf %12, %13 : vector<16x512xf32>
    %cst_5 = arith.constant 0.000000e+00 : f32
    %15 = vector.broadcast %cst_5 : f32 to vector<16x512xf32>
    %16 = arith.cmpf oge, %3, %15 : vector<16x512xf32>
    %cst_6 = arith.constant 1.000000e+00 : f32
    %17 = vector.broadcast %cst_6 : f32 to vector<16x512xf32>
    %18 = arith.select %16, %8, %17 : vector<16x512xi1>, vector<16x512xf32>
    %cst_7 = arith.constant 1.000000e+00 : f32
    %19 = vector.broadcast %cst_7 : f32 to vector<16x512xf32>
    %20 = arith.addf %19, %8 : vector<16x512xf32>
    %21 = arith.divf %18, %20 : vector<16x512xf32>
    %22 = arith.mulf %21, %21 : vector<16x512xf32>
    %23 = arith.mulf %22, %14 : vector<16x512xf32>
    %c1_i32 = arith.constant 1 : i32
    %24 = arith.muli %arg0, %c1_i32 : i32
    %25 = arith.addi %24, %arg1 : i32
    %c0_i32_8 = arith.constant 0 : i32
    %26 = arith.cmpi sge, %25, %c0_i32_8 : i32
    %27 = arith.extui %26 : i1 to i32
    %c0_i32_9 = arith.constant 0 : i32
    %28 = arith.cmpi ne, %27, %c0_i32_9 : i32
    scf.if %28 {
      %35 = tpu.iota {dimensions = array<i32: 0>} : vector<16x512xi32>
      %36 = tpu.iota {dimensions = array<i32: 1>} : vector<16x512xi32>
      %c16_i32 = arith.constant 16 : i32
      %37 = arith.muli %25, %c16_i32 : i32
      %38 = vector.broadcast %37 : i32 to vector<16x512xi32>
      %39 = arith.addi %38, %35 : vector<16x512xi32>
      %c512_i32 = arith.constant 512 : i32
      %40 = vector.broadcast %c512_i32 : i32 to vector<16x512xi32>
      %41 = arith.muli %39, %40 : vector<16x512xi32>
      %42 = arith.addi %41, %36 : vector<16x512xi32>
      %c0_14 = arith.constant 0 : index
      %c0_15 = arith.constant 0 : index
      %43 = vector.load %arg5[%c0_14, %c0_15] : memref<16x512xf32, #tpu.memory_space<vmem>>, vector<16x512xf32>
      %c2048_i32 = arith.constant 2048 : i32
      %44 = vector.broadcast %c2048_i32 : i32 to vector<16x512xi32>
      %45 = arith.cmpi slt, %42, %44 : vector<16x512xi32>
      %cst_16 = arith.constant 0.000000e+00 : f32
      %46 = vector.broadcast %cst_16 : f32 to vector<16x512xf32>
      %47 = arith.select %45, %23, %46 : vector<16x512xi1>, vector<16x512xf32>
      %48 = arith.addf %43, %47 : vector<16x512xf32>
      %c0_17 = arith.constant 0 : index
      %c0_18 = arith.constant 0 : index
      %49 = vector.load %arg5[%c0_17, %c0_18] : memref<16x512xf32, #tpu.memory_space<vmem>>, vector<16x512xf32>
      tpu.vector_store %arg5[%c0_17, %c0_18], %48 {strides = array<i32>} : memref<16x512xf32, #tpu.memory_space<vmem>>, vector<16x512xf32>,
    } else {
    }
    %c0_i32_10 = arith.constant 0 : i32
    %29 = arith.cmpi slt, %25, %c0_i32_10 : i32
    %30 = arith.extui %29 : i1 to i32
    %c0_i32_11 = arith.constant 0 : i32
    %31 = arith.cmpi ne, %30, %c0_i32_11 : i32
    scf.if %31 {
      %c0_14 = arith.constant 0 : index
      %c0_15 = arith.constant 0 : index
      %35 = vector.load %arg5[%c0_14, %c0_15] : memref<16x512xf32, #tpu.memory_space<vmem>>, vector<16x512xf32>
      %36 = arith.addf %35, %23 : vector<16x512xf32>
      %c0_16 = arith.constant 0 : index
      %c0_17 = arith.constant 0 : index
      %37 = vector.load %arg5[%c0_16, %c0_17] : memref<16x512xf32, #tpu.memory_space<vmem>>, vector<16x512xf32>
      tpu.vector_store %arg5[%c0_16, %c0_17], %36 {strides = array<i32>} : memref<16x512xf32, #tpu.memory_space<vmem>>, vector<16x512xf32>,
    } else {
    }
    %c0_i32_12 = arith.constant 0 : i32
    %32 = arith.cmpi eq, %arg1, %c0_i32_12 : i32
    %33 = arith.extui %32 : i1 to i32
    %c0_i32_13 = arith.constant 0 : i32
    %34 = arith.cmpi ne, %33, %c0_i32_13 : i32
    scf.if %34 {
      %c0_14 = arith.constant 0 : index
      %c0_15 = arith.constant 0 : index
      %35 = vector.load %arg5[%c0_14, %c0_15] : memref<16x512xf32, #tpu.memory_space<vmem>>, vector<16x512xf32>
      %36 = vector.shape_cast %35 : vector<16x512xf32> to vector<2x8x512xf32>
      %cst_16 = arith.constant dense<0.000000e+00> : vector<8x512xf32>
      %37 = vector.multi_reduction <add>, %36, %cst_16 [0] : vector<2x8x512xf32> to vector<8x512xf32>
      %38 = vector.shape_cast %37 : vector<8x512xf32> to vector<1x8x512xf32>
      %c0_17 = arith.constant 0 : index
      %c0_18 = arith.constant 0 : index
      %c0_19 = arith.constant 0 : index
      %39 = vector.load %arg4[%c0_17, %c0_18, %c0_19] : memref<1x8x512xf32, #tpu.memory_space<vmem>>, vector<1x8x512xf32>
      tpu.vector_store %arg4[%c0_17, %c0_18, %c0_19], %38 {strides = array<i32>} : memref<1x8x512xf32, #tpu.memory_space<vmem>>, vector<1x8x512xf32>,
    } else {
    }
    return
  }
  func.func @transform_0(%arg0: i32, %arg1: i32) -> (i32, i32) {
    %c1_i32 = arith.constant 1 : i32
    %0 = arith.muli %arg0, %c1_i32 : i32
    %1 = arith.addi %0, %arg1 : i32
    %c0_i32 = arith.constant 0 : i32
    %c0_i32_0 = arith.constant 0 : i32
    return %1, %c0_i32 : i32, i32
  }
  func.func @transform_1(%arg0: i32, %arg1: i32) -> (i32, i32) {
    %c1_i32 = arith.constant 1 : i32
    %0 = arith.muli %arg0, %c1_i32 : i32
    %1 = arith.addi %0, %arg1 : i32
    %c0_i32 = arith.constant 0 : i32
    %c0_i32_0 = arith.constant 0 : i32
    return %1, %c0_i32 : i32, i32
  }
  func.func @transform_2(%arg0: i32, %arg1: i32) -> (i32, i32, i32) {
    %c0_i32 = arith.constant 0 : i32
    %c0_i32_0 = arith.constant 0 : i32
    %c0_i32_1 = arith.constant 0 : i32
    return %arg0, %c0_i32, %c0_i32_0 : i32, i32, i32
  }
}

</mosaic_0001>

<bundles_post_ra>
// kernel: tpu_custom_call.1
= control target key start
LH: loop header
LB: loop body
LE: loop exit
PB: predicated region body
PF: predicated region fallthrough
CT: control target
= control target key end

     0   :  { %7 = vsyncpa [#allocation4], 0  ;;  %s758_s0 = inlined_call_operand.hbm [shape: f32[16,512], index: 0, kind: input, shape index: {}]   ;;  %s759_s1 = inlined_call_operand.hbm [shape: f32[16,512], index: 1, kind: input, shape index: {}]   ;;  %s760_s2 = inlined_call_operand.hbm [shape: f32[1,8,512], index: 2, kind: output, shape index: {}]  }
   0x1   :  { %8 = vsyncpa [#allocation7], 0 }
   0x2   :  { %9 = vsyncpa [#allocation5], 0  ;;  %s529_s9 = smov [#allocation3]   ;;  %s457_s13 = scalar_lea.hbm %s758_s0, 1024 }
   0x3   :  { %s20_s10 = sshll.u32 %s529_s9, 4  ;;  %p458_p0 = scmp.ne.s32.totalorder %s758_s0, %s457_s13  ;;  %s21_s10 = int_to_ptr.vmem [resolvable:$true] %s20_s10 }
   0x4   :  { %p461_p1 = scmp.lt.u32.totalorder %s457_s13, %s758_s0 }
   0x6   :  { %p463_p2 = pnand %p461_p1, %p458_p0 }
   0x8   :  { %466 = shalt.err (!%p463_p2)
}
   0x9   :  { %s467_s18 = scalar_lea.vmem %s21_s10, 1024  ;;  %p472_p4 = scmp.lt.s32.totalorder %s21_s10, %s21_s10 }
   0xa   :  { %p468_p3 = scmp.ne.s32.totalorder %s21_s10, %s467_s18  ;;  %p473_p5 = scmp.lt.s32.totalorder %s467_s18, %s467_s18 }
   0xc   :  { %p474_p6 = por %p473_p5, %p472_p4 }
   0xe   :  { %p475_p7 = pnand %p474_p6, %p468_p3 }
  0x10   :  { %478 = shalt.err (!%p475_p7)
}
  0x11   :  { %s530_s19 = smov 512   ;;  %s531_s20 = smov 32  }
  0x12   :  { %26 = dma.hbm_to_vmem [thread:$0]  %s758_s0, 1024, %s21_s10, [#allocation4], %s530_s19, %s530_s19, %s531_s20  }
  0x13   :  { %s532_s23 = smov [#allocation6]   ;;  %s479_s27 = scalar_lea.hbm %s759_s1, 1024 }
  0x14   :  { %s37_s24 = sshll.u32 %s532_s23, 4  ;;  %p480_p8 = scmp.ne.s32.totalorder %s759_s1, %s479_s27  ;;  %s38_s24 = int_to_ptr.vmem [resolvable:$true] %s37_s24 }
  0x15   :  { %p483_p9 = scmp.lt.u32.totalorder %s479_s27, %s759_s1 }
  0x17   :  { %p485_p10 = pnand %p483_p9, %p480_p8 }
  0x19   :  { %488 = shalt.err (!%p485_p10)
}
  0x1a   :  { %s489_s4 = scalar_lea.vmem %s38_s24, 1024  ;;  %p494_p12 = scmp.lt.s32.totalorder %s38_s24, %s38_s24 }
  0x1b   :  { %p490_p11 = scmp.ne.s32.totalorder %s38_s24, %s489_s4  ;;  %p495_p13 = scmp.lt.s32.totalorder %s489_s4, %s489_s4 }
  0x1d   :  { %p496_p0 = por %p495_p13, %p494_p12 }
  0x1f   :  { %p497_p1 = pnand %p496_p0, %p490_p11 }
  0x21   :  { %500 = shalt.err (!%p497_p1)
}
  0x22   :  { %43 = dma.hbm_to_vmem [thread:$0]  %s759_s1, 1024, %s38_s24, [#allocation7], %s530_s19, %s530_s19, %s531_s20  }
  0x23   :  { %523 = dma.done.wait [#allocation4], 1024  }
  0x24   :  { %524 = vsyncadd [#allocation4], 4294966272 }
  0x25   :  { %525 = dma.done.wait [#allocation7], 1024  }
  0x26   :  { %526 = vsyncadd [#allocation7], 4294966272  ;;  %v279_v0 = vlaneseq  ;;  %v573_v1 = vld [vmem:[#allocation3] sm:$0xff]  ;;  %v579_v6 = vld [vmem:[#allocation3 + $0x8] sm:$0xff]  ;;  %s533_s1 = smov [#allocation8]  }
  0x27   :  { %v575_v2 = vld [vmem:[#allocation3 + $0x20] sm:$0xff]  ;;  %v82_v3 = vand.u32 2147483647, %v573_v1  ;;  %v581_v7 = vld [vmem:[#allocation3 + $0x28] sm:$0xff]  ;;  %v83_v11 = vand.u32 2147483647, %v579_v6 }
  0x28   :  { %v86_v4 = vand.u32 2147483647, %v575_v2  ;;  %v280_v5 = vshrl.u32 %v279_v0, 7  ;;  %v583_v10 = vand.u32 127, %v279_v0  ;;  %v87_v12 = vand.u32 2147483647, %v581_v7 }
  0x29   :  { %v90_v8 = vsub.f32 0.0, %v82_v3  ;;  %v91_v16 = vsub.f32 0.0, %v83_v11  ;;  %v587_v18 = vld [vmem:[#allocation3 + $0x10] sm:$0xff]  ;;  %v74_v25 = vld [vmem:[#allocation6] sm:$0xff]  ;;  %v75_v31 = vld [vmem:[#allocation6 + $0x8] sm:$0xff]  ;;  %v114_v34 = vmax.f32 %v573_v1, 0.0 }
  0x2a   :  { %v94_v9 = vsub.f32 0.0, %v86_v4  ;;  %v281_v15 = vadd.s32 8, %v280_v5  ;;  %v95_v17 = vsub.f32 0.0, %v87_v12  ;;  %v589_v19 = vmul.u32 512, %v280_v5  ;;  %v592_v21 = vld [vmem:[#allocation3 + $0x30] sm:$0xff]  ;;  %v78_v27 = vld [vmem:[#allocation6 + $0x20] sm:$0xff] }
  0x2b   :  { %v98_v13 = vmul.f32 1.442695, %v90_v8  ;;  %v284_v20 = vadd.s32 128, %v583_v10  ;;  %v100_v22 = vmul.f32 1.442695, %v91_v16  ;;  %v595_v24 = vadd.s32 256, %v583_v10 }
  0x2c   :  { %v106_v14 = vmul.f32 1.442695, %v94_v9  ;;  %v108_v23 = vmul.f32 1.442695, %v95_v17  ;;  %v84_v26 = vand.u32 2147483647, %v587_v18  ;;  %v603_v30 = vadd.s32 %v589_v19, %v583_v10 }
  0x2d   :  { %409 = vpow2.f32 %v98_v13  ;;  %v598_v28 = vmul.u32 512, %v281_v15  ;;  %v88_v29 = vand.u32 2147483647, %v592_v21  ;;  %v606_v32 = vadd.s32 %v589_v19, %v284_v20  ;;  %v79_v36 = vld [vmem:[#allocation6 + $0x28] sm:$0xff]  ;;  %v76_v41 = vld [vmem:[#allocation6 + $0x10] sm:$0xff]  ;;  %v620_v47 = vld [vmem:[#allocation3 + $0x18] sm:$0xff] }
  0x2e   :  { %411 = vpow2.f32 %v106_v14  ;;  %v92_v33 = vsub.f32 0.0, %v84_v26  ;;  %v122_v35 = vmul.f32 %v74_v25, %v573_v1  ;;  %v612_v38 = vadd.s32 %v589_v19, %v595_v24  ;;  %v80_v42 = vld [vmem:[#allocation6 + $0x30] sm:$0xff]  ;;  %v625_v51 = vld [vmem:[#allocation3 + $0x38] sm:$0xff]  ;;  %s394_s6 = sshll.u32 %s533_s1, 4  ;;  %s395_s6 = int_to_ptr.vmem [resolvable:$true] %s394_s6 }
  0x2f   :  { %413 = vpow2.f32 %v100_v22  ;;  %v96_v37 = vsub.f32 0.0, %v88_v29  ;;  %v118_v39 = vmax.f32 %v575_v2, 0.0  ;;  %v126_v40 = vmul.f32 %v78_v27, %v575_v2  ;;  %s501_s7 = scalar_lea.vmem %s395_s6, 512  ;;  %p506_p3 = scmp.lt.s32.totalorder %s395_s6, %s395_s6 }
  0x30   :  { %415 = vpow2.f32 %v108_v23  ;;  %vm218_vm0 = vcmp.ge.f32.partialorder %v573_v1, 0.0  ;;  %v102_v43 = vmul.f32 1.442695, %v92_v33  ;;  %vm222_vm1 = vcmp.ge.f32.partialorder %v575_v2, 0.0  ;;  %p502_p2 = scmp.ne.s32.totalorder %s395_s6, %s501_s7  ;;  %p507_p4 = scmp.lt.s32.totalorder %s501_s7, %s501_s7 }
  0x31   :  { %v115_v44 = vmax.f32 %v579_v6, 0.0  ;;  %v123_v45 = vmul.f32 %v75_v31, %v579_v6  ;;  %v110_v46 = vmul.f32 1.442695, %v96_v37  ;;  %v119_v48 = vmax.f32 %v581_v7, 0.0 }
  0x32   :  { %v127_v49 = vmul.f32 %v79_v36, %v581_v7  ;;  %417 = vpow2.f32 %v102_v43  ;;  %v116_v50 = vmax.f32 %v587_v18, 0.0  ;;  %v120_v52 = vmax.f32 %v592_v21, 0.0  ;;  %p508_p5 = por %p507_p4, %p506_p3 }
  0x33   :  { %419 = vpow2.f32 %v110_v46  ;;  %v124_v53 = vmul.f32 %v76_v41, %v587_v18  ;;  %v128_v54 = vmul.f32 %v80_v42, %v592_v21  ;;  %v630_v56 = vsub.f32 %v114_v34, %v122_v35 }
  0x34   :  { %v632_v57 = vsub.f32 %v118_v39, %v126_v40  ;;  %v636_v58 = vadd.s32 %v598_v28, %v583_v10  ;;  %v85_v59 = vand.u32 2147483647, %v620_v47  ;;  %v639_v62 = vsub.f32 %v115_v44, %v123_v45  ;;  %p509_p6 = pnand %p508_p5, %p502_p2 }
  0x35   :  { %vm219_vm2 = vcmp.ge.f32.partialorder %v579_v6, 0.0  ;;  %vm223_vm3 = vcmp.ge.f32.partialorder %v581_v7, 0.0  ;;  %v89_v63 = vand.u32 2147483647, %v625_v51  ;;  %v644_v4 = vsub.f32 %v119_v48, %v127_v49 }
  0x36   :  { %v647_v5 = vadd.s32 %v598_v28, %v284_v20  ;;  %v649_v11 = vsub.f32 %v116_v50, %v124_v53  ;;  %v651_v12 = vsub.f32 %v120_v52, %v128_v54  ;;  %v93_v16 = vsub.f32 0.0, %v85_v59 }
  0x37   :  { %v410_v55 = vpop.eup %409  ;;  %v97_v23 = vsub.f32 0.0, %v89_v63  ;;  %vm220_vm5 = vcmp.ge.f32.partialorder %v587_v18, 0.0  ;;  %vm309_vm7 = vcmp.lt.s32.totalorder %v603_v30, 2048  ;;  %vm313_vm8 = vcmp.lt.s32.totalorder %v636_v58, 2048 }
  0x38   :  { %v412_v60 = vpop.eup %411  ;;  %v138_v61 = vadd.f32 1.0, %v410_v55  ;;  %v141_v0 = vmul.f32 -0.5, %v410_v55  ;;  %v144_v14 = vand.u32 2147483647, %v410_v55  ;;  %v226_v29 = vsel %vm218_vm0, %v410_v55, 1.0 }
  0x39   :  { %v174_v3 = vadd.f32 1.0, %v412_v60  ;;  %v414_v8 = vpop.eup %413  ;;  %v177_v9 = vmul.f32 -0.5, %v412_v60  ;;  %v180_v17 = vand.u32 2147483647, %v412_v60  ;;  %v230_v31 = vsel %vm222_vm1, %v412_v60, 1.0 }
  0x3a   :  { %421 = vlog2.f32 %v138_v61  ;;  %v416_v13 = vpop.eup %415  ;;  %v147_v15 = vadd.f32 1.0, %v414_v8  ;;  %v150_v22 = vmul.f32 -0.5, %v414_v8  ;;  %v142_v25 = vadd.f32 1.0, %v141_v0 }
  0x3b   :  { %423 = vlog2.f32 %v174_v3  ;;  %v183_v20 = vadd.f32 1.0, %v416_v13  ;;  %v186_v26 = vmul.f32 -0.5, %v416_v13  ;;  %v178_v27 = vadd.f32 1.0, %v177_v9 }
  0x3c   :  { %425 = vrcp.f32 %v138_v61  ;;  %v418_v33 = vpop.eup %417  ;;  %vm657_vm4 = vcmp.lt.f32.partialorder %v144_v14, 0.0004427343  ;;  %v153_v35 = vand.u32 2147483647, %v414_v8  ;;  %v104_v36 = vmul.f32 1.442695, %v93_v16 }
  0x3d   :  { %427 = vrcp.f32 %v174_v3  ;;  %v662_v37 = vpop.eup %419  ;;  %v151_v39 = vadd.f32 1.0, %v150_v22  ;;  %v189_v40 = vand.u32 2147483647, %v416_v13  ;;  %v156_v1 = vadd.f32 1.0, %v418_v33 }
  0x3e   :  { %429 = vlog2.f32 %v147_v15  ;;  %v143_v41 = vmul.f32 %v410_v55, %v142_v25  ;;  %vm664_vm6 = vcmp.lt.f32.partialorder %v180_v17, 0.0004427343  ;;  %v187_v42 = vadd.f32 1.0, %v186_v26 }
  0x3f   :  { %431 = vlog2.f32 %v183_v20  ;;  %v179_v43 = vmul.f32 %v412_v60, %v178_v27  ;;  %v159_v44 = vmul.f32 -0.5, %v418_v33  ;;  %v192_v45 = vadd.f32 1.0, %v662_v37 }
  0x40   :  { %433 = vrcp.f32 %v147_v15  ;;  %vm671_vm9 = vcmp.lt.f32.partialorder %v153_v35, 0.0004427343  ;;  %v227_v48 = vsel %vm219_vm2, %v414_v8, 1.0  ;;  %v231_v49 = vsel %vm223_vm3, %v416_v13, 1.0 }
  0x41   :  { %435 = vrcp.f32 %v183_v20  ;;  %v195_v50 = vmul.f32 -0.5, %v662_v37  ;;  %vm224_vm10 = vcmp.ge.f32.partialorder %v592_v21, 0.0  ;;  %v152_v53 = vmul.f32 %v414_v8, %v151_v39 }
  0x42   :  { %437 = vlog2.f32 %v156_v1  ;;  %vm681_vm11 = vcmp.lt.f32.partialorder %v189_v40, 0.0004427343  ;;  %v112_v55 = vmul.f32 1.442695, %v97_v23  ;;  %v188_v61 = vmul.f32 %v416_v13, %v187_v42 }
  0x43   :  { %439 = vlog2.f32 %v192_v45  ;;  %v162_v6 = vand.u32 2147483647, %v418_v33  ;;  %vm310_vm12 = vcmp.lt.s32.totalorder %v606_v32, 2048  ;;  %v160_v0 = vadd.f32 1.0, %v159_v44 }
  0x44   :  { %v422_v52 = vpop.eup %421  ;;  %441 = vrcp.f32 %v156_v1  ;;  %v198_v3 = vand.u32 2147483647, %v662_v37  ;;  %vm314_vm13 = vcmp.lt.s32.totalorder %v647_v5, 2048  ;;  %v196_v15 = vadd.f32 1.0, %v195_v50 }
  0x45   :  { %v424_v59 = vpop.eup %423  ;;  %v140_v60 = vmul.f32 0.6931472, %v422_v52  ;;  %443 = vrcp.f32 %v192_v45  ;;  %vm694_vm14 = vcmp.lt.f32.partialorder %v162_v6, 0.0004427343  ;;  %v228_v39 = vsel %vm220_vm5, %v418_v33, 1.0 }
  0x46   :  { %v426_v63 = vpop.eup %425  ;;  %v176_v7 = vmul.f32 0.6931472, %v424_v59  ;;  %445 = vpow2.f32 %v104_v36  ;;  %v161_v36 = vmul.f32 %v418_v33, %v160_v0  ;;  %vm711_vm15 = vcmp.lt.f32.partialorder %v198_v3, 0.0004427343 }
  0x47   :  { %v428_v8 = vpop.eup %427  ;;  %v146_v9 = vsel %vm657_vm4, %v143_v41, %v140_v60  ;;  %v243_v14 = vmul.f32 %v426_v63, %v226_v29  ;;  %447 = vpow2.f32 %v112_v55  ;;  %v299_v6 = vadd.s32 %v598_v28, %v595_v24 }
  0x48   :  { %v430_v13 = vpop.eup %429  ;;  %v182_v16 = vsel %vm664_vm6, %v179_v43, %v176_v7  ;;  %v210_v17 = vadd.f32 %v146_v9, %v630_v56  ;;  %v251_v22 = vmul.f32 %v428_v8, %v230_v31  ;;  %vm311_vm0 = vcmp.lt.s32.totalorder %v612_v38, 2048 }
  0x49   :  { %v432_v23 = vpop.eup %431  ;;  %v214_v25 = vadd.f32 %v182_v16, %v632_v57  ;;  %v258_v20 = vmul.f32 %v243_v14, %v243_v14  ;;  %v149_v26 = vmul.f32 0.6931472, %v430_v13  ;;  %v197_v57 = vmul.f32 %v662_v37, %v196_v15 }
  0x4a   :  { %v434_v29 = vpop.eup %433  ;;  %v262_v34 = vmul.f32 %v251_v22, %v251_v22  ;;  %v185_v35 = vmul.f32 0.6931472, %v432_v23  ;;  %vm315_vm1 = vcmp.lt.s32.totalorder %v299_v6, 2048  ;;  %v117_v38 = vmax.f32 %v620_v47, 0.0 }
  0x4b   :  { %v436_v40 = vpop.eup %435  ;;  %v266_v56 = vmul.f32 %v258_v20, %v210_v17  ;;  %v155_v31 = vsel %vm671_vm9, %v152_v53, %v149_v26  ;;  %v245_v1 = vmul.f32 %v434_v29, %v227_v48  ;;  %vm221_vm2 = vcmp.ge.f32.partialorder %v620_v47, 0.0 }
  0x4c   :  { %v438_v41 = vpop.eup %437  ;;  %v270_v2 = vmul.f32 %v262_v34, %v214_v25  ;;  %v191_v42 = vsel %vm681_vm11, %v188_v61, %v185_v35  ;;  %v211_v43 = vadd.f32 %v155_v31, %v639_v62  ;;  %v253_v44 = vmul.f32 %v436_v40, %v231_v49  ;;  %v77_v25 = vld [vmem:[#allocation6 + $0x18] sm:$0xff] }
  0x4d   :  { %v317_v18 = vsel %vm309_vm7, %v266_v56, 0.0  ;;  %v215_v33 = vadd.f32 %v191_v42, %v644_v4  ;;  %v259_v45 = vmul.f32 %v245_v1, %v245_v1  ;;  %v158_v50 = vmul.f32 0.6931472, %v438_v41  ;;  %v440_v46 = vpop.eup %439 }
  0x4e   :  { %v321_v48 = vsel %vm313_vm8, %v270_v2, 0.0  ;;  %v263_v52 = vmul.f32 %v253_v44, %v253_v44  ;;  %v232_v62 = vsel %vm224_vm10, %v662_v37, 1.0  ;;  %v442_v49 = vpop.eup %441  ;;  %v194_v55 = vmul.f32 0.6931472, %v440_v46 }
  0x4f   :  { %v380_v30 = vadd.f32 %v321_v48, %v317_v18  ;;  %v267_v54 = vmul.f32 %v259_v45, %v211_v43  ;;  %v164_v4 = vsel %vm694_vm14, %v161_v36, %v158_v50  ;;  %v444_v59 = vpop.eup %443  ;;  %v247_v61 = vmul.f32 %v442_v49, %v228_v39 }
  0x50   :  { %v271_v60 = vmul.f32 %v263_v52, %v215_v33  ;;  %v212_v58 = vadd.f32 %v164_v4, %v649_v11  ;;  %v446_v63 = vpop.eup %445  ;;  %v200_v37 = vsel %vm711_vm15, %v197_v57, %v194_v55  ;;  %v255_v7 = vmul.f32 %v444_v59, %v232_v62 }
  0x51   :  { %384 = vst [vmem:[#allocation8] sm:$0xff] %v380_v30  ;;  %v318_v21 = vsel %vm310_vm12, %v267_v54, 0.0  ;;  %v448_v0 = vpop.eup %447  ;;  %v216_v8 = vadd.f32 %v200_v37, %v651_v12  ;;  %v260_v11 = vmul.f32 %v247_v61, %v247_v61  ;;  %v165_v9 = vadd.f32 1.0, %v446_v63  ;;  %v81_v12 = vld [vmem:[#allocation6 + $0x38] sm:$0xff] }
  0x52   :  { %v322_v3 = vsel %vm314_vm13, %v271_v60, 0.0  ;;  %v264_v15 = vmul.f32 %v255_v7, %v255_v7  ;;  %v201_v32 = vadd.f32 1.0, %v448_v0  ;;  %v168_v16 = vmul.f32 -0.5, %v446_v63 }
  0x53   :  { %v381_v14 = vadd.f32 %v322_v3, %v318_v21  ;;  %v268_v24 = vmul.f32 %v260_v11, %v212_v58  ;;  %449 = vlog2.f32 %v165_v9  ;;  %v204_v5 = vmul.f32 -0.5, %v448_v0 }
  0x54   :  { %v272_v13 = vmul.f32 %v264_v15, %v216_v8  ;;  %451 = vlog2.f32 %v201_v32  ;;  %v169_v20 = vadd.f32 1.0, %v168_v16  ;;  %v171_v26 = vand.u32 2147483647, %v446_v63 }
  0x55   :  { %385 = vst [vmem:[#allocation8 + $0x8] sm:$0xff] %v381_v14  ;;  %v319_v17 = vsel %vm311_vm0, %v268_v24, 0.0  ;;  %453 = vrcp.f32 %v165_v9  ;;  %v125_v27 = vmul.f32 %v77_v25, %v620_v47  ;;  %v205_v29 = vadd.f32 1.0, %v204_v5 }
  0x56   :  { %v323_v22 = vsel %vm315_vm1, %v272_v13, 0.0  ;;  %455 = vrcp.f32 %v201_v32  ;;  %v121_v34 = vmax.f32 %v625_v51, 0.0  ;;  %v129_v35 = vmul.f32 %v81_v12, %v625_v51 }
  0x57   :  { %v382_v23 = vadd.f32 %v323_v22, %v319_v17  ;;  %v207_v36 = vand.u32 2147483647, %v448_v0  ;;  %v170_v39 = vmul.f32 %v446_v63, %v169_v20  ;;  %vm736_vm3 = vcmp.lt.f32.partialorder %v171_v26, 0.0004427343 }
  0x58   :  { %vm225_vm4 = vcmp.ge.f32.partialorder %v625_v51, 0.0  ;;  %v286_v31 = vadd.s32 384, %v583_v10  ;;  %v133_v1 = vsub.f32 %v117_v38, %v125_v27  ;;  %v206_v41 = vmul.f32 %v448_v0, %v205_v29 }
  0x59   :  { %386 = vst [vmem:[#allocation8 + $0x10] sm:$0xff] %v382_v23  ;;  %v137_v42 = vsub.f32 %v121_v34, %v129_v35  ;;  %vm208_vm5 = vcmp.lt.f32.partialorder %v207_v36, 0.0004427343  ;;  %v229_v43 = vsel %vm221_vm2, %v446_v63, 1.0  ;;  %v233_v18 = vsel %vm225_vm4, %v448_v0, 1.0 }
  0x5a   :  { %v296_v45 = vadd.s32 %v589_v19, %v286_v31  ;;  %v300_v10 = vadd.s32 %v598_v28, %v286_v31 }
  0x5c   :  { %vm312_vm6 = vcmp.lt.s32.totalorder %v296_v45, 2048  ;;  %vm316_vm7 = vcmp.lt.s32.totalorder %v300_v10, 2048 }
  0x5d   :  { %v450_v40 = vpop.eup %449 }
  0x5e   :  { %v167_v57 = vmul.f32 0.6931472, %v450_v40  ;;  %v452_v2 = vpop.eup %451 }
  0x5f   :  { %v203_v47 = vmul.f32 0.6931472, %v452_v2  ;;  %v454_v33 = vpop.eup %453 }
  0x60   :  { %v173_v44 = vsel %vm736_vm3, %v170_v39, %v167_v57  ;;  %v456_v50 = vpop.eup %455  ;;  %v249_v48 = vmul.f32 %v454_v33, %v229_v43 }
  0x61   :  { %v209_v46 = vsel %vm208_vm5, %v206_v41, %v203_v47  ;;  %v213_v51 = vadd.f32 %v173_v44, %v133_v1  ;;  %v257_v53 = vmul.f32 %v456_v50, %v233_v18 }
  0x62   :  { %v217_v52 = vadd.f32 %v209_v46, %v137_v42  ;;  %v261_v62 = vmul.f32 %v249_v48, %v249_v48 }
  0x63   :  { %v265_v49 = vmul.f32 %v257_v53, %v257_v53 }
  0x64   :  { %v269_v30 = vmul.f32 %v261_v62, %v213_v51 }
  0x65   :  { %v273_v54 = vmul.f32 %v265_v49, %v217_v52 }
  0x66   :  { %v320_v4 = vsel %vm312_vm6, %v269_v30, 0.0 }
  0x67   :  { %v324_v55 = vsel %vm316_vm7, %v273_v54, 0.0 }
  0x68   :  { %v383_v59 = vadd.f32 %v324_v55, %v320_v4 }
  0x6a   :  { %387 = vst [vmem:[#allocation8 + $0x18] sm:$0xff] %v383_v59 }
  0x6b   :  { %512 = shalt.err (!%p509_p6)
}
  0x6c   :  { %s513_s10 = scalar_lea.hbm %s760_s2, 512 }
  0x6d   :  { %p514_p7 = scmp.ne.s32.totalorder %s760_s2, %s513_s10  ;;  %p517_p8 = scmp.lt.u32.totalorder %s513_s10, %s760_s2 }
  0x6f   :  { %p519_p9 = pnand %p517_p8, %p514_p7 }
  0x71   :  { %522 = shalt.err (!%p519_p9)
}
  0x72   :  { %397 = dma.vmem_to_hbm [thread:$0]  %s395_s6, 512, %s760_s2, [#allocation5]  }
  0x73   :  { %527 = dma.done.wait [#allocation5], 512  }
  0x74   :  { %528 = vsyncadd [#allocation5], 4294966784 }
  0x75   :  { %401 = vsyncpa [#allocation4], 1 }
  0x76   :  { %402 = vsyncpa [#allocation7], 1 }
  0x77   :  { %403 = vsyncpa [#allocation5], 1 }

</bundles_post_ra>
